<compile_context>
chip_gen: v7x
topology: tpu7x:2x2x1
jax: 0.10.0
libtpu: 0.0.40
codegen_flags: <defaults>
</compile_context>

<pallas_src>
import functools

import jax
import jax.numpy as jnp
from jax.experimental import pallas as pl
from jax.experimental.pallas import tpu as pltpu


def _nll_surv_kernel(h_ref, y_ref, c_ref, loss_ref, *, alpha, eps):
    # Lane-dense layout: batch on the lane (last) axis, time bins on sublanes.
    h = h_ref[...].astype(jnp.float32)       # (T, TB)
    y = y_ref[...]                           # (1, TB) int32
    c = c_ref[...].astype(jnp.float32)       # (1, TB)

    T, TB = h.shape

    # log-sigmoid identities (one exp + one log per element on the EUP):
    #   softplus(h)         = log(1 + exp(h))
    #   log(1 - sigmoid(h)) = -softplus(h)
    #   log(sigmoid(h))     =  h - softplus(h)
    sp = jnp.maximum(h, 0.0) + jnp.log(1.0 + jnp.exp(-jnp.abs(h)))
    log1m = -sp                              # log(1 - hazards)
    log_haz = h - sp                         # log(hazards)

    t_idx = jax.lax.broadcasted_iota(jnp.int32, (T, TB), 0)   # time index on sublanes
    onehot = (t_idx == y).astype(jnp.float32)                 # (T, TB)

    # S_padded[y]   = prod_{j <  y} (1 - hazards[j])  -> sum of log1m over j < y
    # S_padded[y+1] = prod_{j <= y} (1 - hazards[j])  -> previous + log1m[y]
    log_s_prev = jnp.sum(jnp.where(t_idx < y, log1m, 0.0), axis=0, keepdims=True)  # (1, TB)
    log1m_at_y = jnp.sum(onehot * log1m, axis=0, keepdims=True)                    # (1, TB)
    log_h_at_y = jnp.sum(onehot * log_haz, axis=0, keepdims=True)                  # (1, TB)
    log_s_this = log_s_prev + log1m_at_y

    # torch: log(clamp(x, min=eps)) == max(log(x), log(eps)); stay in log space.
    log_eps = jnp.float32(jnp.log(eps))
    log_s_prev = jnp.maximum(log_s_prev, log_eps)
    log_s_this = jnp.maximum(log_s_this, log_eps)
    log_h_at_y = jnp.maximum(log_h_at_y, log_eps)

    uncensored = -(1.0 - c) * (log_s_prev + log_h_at_y)       # (1, TB)
    censored = -c * log_s_this                                # (1, TB)
    neg_l = censored + uncensored
    loss_ref[...] = (1.0 - alpha) * neg_l + alpha * uncensored   # lane-dense store


def nll_surv_loss(h, y, c, alpha=0.0, eps=1e-7, reduction="sum", block_b=512):
    """Pallas TPU implementation of NLLSurvLoss.forward(h, y, c).

    h: (B, T) logits over discrete time bins (any float dtype; upcast in-kernel)
    y: (B,)   int time-bin labels in [0, T-1]
    c: (B,)   censorship indicator (0 = event, 1 = censored)
    """
    if reduction not in ("sum", "mean"):
        raise ValueError("Bad input for reduction: {}".format(reduction))
    B, T = h.shape

    # Lane-dense layout: batch on the lane axis, padded to a multiple of the
    # per-block batch tile (itself a multiple of 128 lanes).
    tb = min(block_b, pl.cdiv(B, 128) * 128)
    b_pad = pl.cdiv(B, tb) * tb

    h_t = jnp.pad(jnp.transpose(h), ((0, 0), (0, b_pad - B)))          # (T, Bp), native dtype
    y2 = jnp.pad(y.reshape(1, -1).astype(jnp.int32), ((0, 0), (0, b_pad - B)))
    c2 = jnp.pad(c.reshape(1, -1).astype(jnp.float32), ((0, 0), (0, b_pad - B)))

    kernel = functools.partial(_nll_surv_kernel, alpha=float(alpha), eps=float(eps))
    per_sample = pl.pallas_call(
        kernel,
        out_shape=jax.ShapeDtypeStruct((1, b_pad), jnp.float32),
        grid=(b_pad // tb,),
        in_specs=[
            pl.BlockSpec((T, tb), lambda i: (0, i)),   # logits block (time x batch-tile)
            pl.BlockSpec((1, tb), lambda i: (0, i)),   # labels
            pl.BlockSpec((1, tb), lambda i: (0, i)),   # censorship
        ],
        out_specs=pl.BlockSpec((1, tb), lambda i: (0, i)),
        compiler_params=pltpu.CompilerParams(
            dimension_semantics=("parallel",),         # batch blocks are independent
            vmem_limit_bytes=32 << 20,                 # safe on v5e/v6e/v7x; blocks are tiny
        ),
    )(h_t, y2, c2)

    total = jnp.sum(per_sample[0, :B])                 # drop padded lanes, reduce in wrapper
    if reduction == "mean":
        total = total / B
    return total


def _reference_nll_surv_loss(h, y, c, alpha=0.0, eps=1e-7, reduction="sum"):
    """Pure-JAX transcription of the PyTorch code (for validation only)."""
    h = h.astype(jnp.float32)
    y = y.reshape(-1, 1).astype(jnp.int32)
    c = c.reshape(-1, 1).astype(jnp.float32)
    hazards = jax.nn.sigmoid(h)
    S = jnp.cumprod(1.0 - hazards, axis=1)
    S_padded = jnp.concatenate([jnp.ones_like(c), S], axis=1)
    s_prev = jnp.clip(jnp.take_along_axis(S_padded, y, axis=1), eps, None)
    h_this = jnp.clip(jnp.take_along_axis(hazards, y, axis=1), eps, None)
    s_this = jnp.clip(jnp.take_along_axis(S_padded, y + 1, axis=1), eps, None)
    uncensored = -(1.0 - c) * (jnp.log(s_prev) + jnp.log(h_this))
    censored = -c * jnp.log(s_this)
    neg_l = censored + uncensored
    loss = (1.0 - alpha) * neg_l + alpha * uncensored
    if reduction == "mean":
        return jnp.mean(loss)
    return jnp.sum(loss)


if __name__ == "__main__":
    B, T = 8, 16
    key = jax.random.PRNGKey(0)
    kh, ky, kc = jax.random.split(key, 3)

    h = jax.random.normal(kh, (B, T), dtype=jnp.float32) * 2.0   # logits over time bins
    y = jax.random.randint(ky, (B,), 0, T, dtype=jnp.int32)      # time-bin labels
    c = jax.random.bernoulli(kc, 0.3, (B,)).astype(jnp.float32)  # censorship indicator

    # reduction='sum', alpha=0.0 (module defaults)
    out = jax.block_until_ready(nll_surv_loss(h, y, c, alpha=0.0, eps=1e-7, reduction="sum"))
    ref = _reference_nll_surv_loss(h, y, c, alpha=0.0, eps=1e-7, reduction="sum")
    assert jnp.allclose(out, ref, rtol=1e-4, atol=1e-5), (out, ref)

    # reduction='mean', alpha=0.4
    out_m = jax.block_until_ready(nll_surv_loss(h, y, c, alpha=0.4, eps=1e-7, reduction="mean"))
    ref_m = _reference_nll_surv_loss(h, y, c, alpha=0.4, eps=1e-7, reduction="mean")
    assert jnp.allclose(out_m, ref_m, rtol=1e-4, atol=1e-5), (out_m, ref_m)

    # native bf16 logits (no wrapper upcast; kernel upcasts after load)
    h_bf = h.astype(jnp.bfloat16)
    out_bf = jax.block_until_ready(nll_surv_loss(h_bf, y, c, reduction="sum"))
    ref_bf = _reference_nll_surv_loss(h_bf.astype(jnp.float32), y, c, reduction="sum")
    assert jnp.allclose(out_bf, ref_bf, rtol=1e-3, atol=1e-4), (out_bf, ref_bf)

    print("KERNEL_OK")
</pallas_src>

<mosaic_0001>
module attributes {stable_mosaic.version = 11 : i64} {
  func.func @_nll_surv_kernel(%arg0: i32, %arg1: memref<16x128xf32, #tpu.memory_space<vmem>>, %arg2: memref<1x128xi32, #tpu.memory_space<vmem>>, %arg3: memref<1x128xf32, #tpu.memory_space<vmem>>, %arg4: memref<1x128xf32, #tpu.memory_space<vmem>>) attributes {dimension_semantics = [#tpu.dimension_semantics<parallel>], iteration_bounds = array<i64: 1>, scalar_prefetch = 0 : i64, scratch_operands = 0 : i64, tpu.core_type = #tpu.core_type<tc>, window_params = [{transform_indices = @transform_0, window_bounds = array<i64: 16, 128>}, {transform_indices = @transform_1, window_bounds = array<i64: 1, 128>}, {transform_indices = @transform_2, window_bounds = array<i64: 1, 128>}, {transform_indices = @transform_3, window_bounds = array<i64: 1, 128>}]} {
    %c0 = arith.constant 0 : index
    %c0_0 = arith.constant 0 : index
    %0 = vector.load %arg1[%c0, %c0_0] : memref<16x128xf32, #tpu.memory_space<vmem>>, vector<16x128xf32>
    %c0_1 = arith.constant 0 : index
    %c0_2 = arith.constant 0 : index
    %1 = vector.load %arg2[%c0_1, %c0_2] : memref<1x128xi32, #tpu.memory_space<vmem>>, vector<1x128xi32>
    %c0_3 = arith.constant 0 : index
    %c0_4 = arith.constant 0 : index
    %2 = vector.load %arg3[%c0_3, %c0_4] : memref<1x128xf32, #tpu.memory_space<vmem>>, vector<1x128xf32>
    %cst = arith.constant 0.000000e+00 : f32
    %3 = vector.broadcast %cst : f32 to vector<16x128xf32>
    %4 = arith.maximumf %0, %3 : vector<16x128xf32>
    %5 = math.absf %0 : vector<16x128xf32>
    %cst_5 = arith.constant 0.000000e+00 : f32
    %6 = vector.broadcast %cst_5 : f32 to vector<16x128xf32>
    %7 = arith.subf %6, %5 : vector<16x128xf32>
    %8 = math.exp %7 : vector<16x128xf32>
    %cst_6 = arith.constant 1.000000e+00 : f32
    %9 = vector.broadcast %cst_6 : f32 to vector<16x128xf32>
    %10 = arith.addf %9, %8 : vector<16x128xf32>
    %11 = math.log %10 : vector<16x128xf32>
    %12 = arith.addf %4, %11 : vector<16x128xf32>
    %cst_7 = arith.constant 0.000000e+00 : f32
    %13 = vector.broadcast %cst_7 : f32 to vector<16x128xf32>
    %14 = arith.subf %13, %12 : vector<16x128xf32>
    %15 = arith.subf %0, %12 : vector<16x128xf32>
    %16 = tpu.iota {dimensions = array<i32: 0>} : vector<16x128xi32>
    %17 = vector.broadcast %1 : vector<1x128xi32> to vector<16x128xi32>
    %18 = arith.cmpi eq, %16, %17 : vector<16x128xi32>
    %19 = arith.extui %18 : vector<16x128xi1> to vector<16x128xi32>
    %20 = arith.sitofp %19 : vector<16x128xi32> to vector<16x128xf32>
    %21 = vector.broadcast %1 : vector<1x128xi32> to vector<16x128xi32>
    %22 = arith.cmpi slt, %16, %21 : vector<16x128xi32>
    %cst_8 = arith.constant 0.000000e+00 : f32
    %23 = vector.broadcast %cst_8 : f32 to vector<16x128xf32>
    %24 = arith.select %22, %14, %23 : vector<16x128xi1>, vector<16x128xf32>
    %cst_9 = arith.constant dense<0.000000e+00> : vector<128xf32>
    %25 = vector.multi_reduction <add>, %24, %cst_9 [0] : vector<16x128xf32> to vector<128xf32>
    %26 = vector.shape_cast %25 : vector<128xf32> to vector<1x128xf32>
    %27 = arith.mulf %20, %14 : vector<16x128xf32>
    %cst_10 = arith.constant dense<0.000000e+00> : vector<128xf32>
    %28 = vector.multi_reduction <add>, %27, %cst_10 [0] : vector<16x128xf32> to vector<128xf32>
    %29 = vector.shape_cast %28 : vector<128xf32> to vector<1x128xf32>
    %30 = arith.mulf %20, %15 : vector<16x128xf32>
    %cst_11 = arith.constant dense<0.000000e+00> : vector<128xf32>
    %31 = vector.multi_reduction <add>, %30, %cst_11 [0] : vector<16x128xf32> to vector<128xf32>
    %32 = vector.shape_cast %31 : vector<128xf32> to vector<1x128xf32>
    %33 = arith.addf %26, %29 : vector<1x128xf32>
    %cst_12 = arith.constant 1.000000e-07 : f32
    %34 = math.log %cst_12 : f32
    %35 = vector.broadcast %34 : f32 to vector<1x128xf32>
    %36 = arith.maximumf %26, %35 : vector<1x128xf32>
    %37 = vector.broadcast %34 : f32 to vector<1x128xf32>
    %38 = arith.maximumf %33, %37 : vector<1x128xf32>
    %39 = vector.broadcast %34 : f32 to vector<1x128xf32>
    %40 = arith.maximumf %32, %39 : vector<1x128xf32>
    %cst_13 = arith.constant 1.000000e+00 : f32
    %41 = vector.broadcast %cst_13 : f32 to vector<1x128xf32>
    %42 = arith.subf %41, %2 : vector<1x128xf32>
    %cst_14 = arith.constant 0.000000e+00 : f32
    %43 = vector.broadcast %cst_14 : f32 to vector<1x128xf32>
    %44 = arith.subf %43, %42 : vector<1x128xf32>
    %45 = arith.addf %36, %40 : vector<1x128xf32>
    %46 = arith.mulf %44, %45 : vector<1x128xf32>
    %cst_15 = arith.constant 0.000000e+00 : f32
    %47 = vector.broadcast %cst_15 : f32 to vector<1x128xf32>
    %48 = arith.subf %47, %2 : vector<1x128xf32>
    %49 = arith.mulf %48, %38 : vector<1x128xf32>
    %50 = arith.addf %49, %46 : vector<1x128xf32>
    %cst_16 = arith.constant 1.000000e+00 : f32
    %51 = vector.broadcast %cst_16 : f32 to vector<1x128xf32>
    %52 = arith.mulf %51, %50 : vector<1x128xf32>
    %cst_17 = arith.constant 0.000000e+00 : f32
    %53 = vector.broadcast %cst_17 : f32 to vector<1x128xf32>
    %54 = arith.mulf %53, %46 : vector<1x128xf32>
    %55 = arith.addf %52, %54 : vector<1x128xf32>
    %c0_18 = arith.constant 0 : index
    %c0_19 = arith.constant 0 : index
    %56 = vector.load %arg4[%c0_18, %c0_19] : memref<1x128xf32, #tpu.memory_space<vmem>>, vector<1x128xf32>
    tpu.vector_store %arg4[%c0_18, %c0_19], %55 {strides = array<i32>} : memref<1x128xf32, #tpu.memory_space<vmem>>, vector<1x128xf32>,
    return
  }
  func.func @transform_0(%arg0: i32) -> (i32, i32) {
    %c0_i32 = arith.constant 0 : i32
    %c0_i32_0 = arith.constant 0 : i32
    return %c0_i32, %arg0 : i32, i32
  }
  func.func @transform_1(%arg0: i32) -> (i32, i32) {
    %c0_i32 = arith.constant 0 : i32
    %c0_i32_0 = arith.constant 0 : i32
    return %c0_i32, %arg0 : i32, i32
  }
  func.func @transform_2(%arg0: i32) -> (i32, i32) {
    %c0_i32 = arith.constant 0 : i32
    %c0_i32_0 = arith.constant 0 : i32
    return %c0_i32, %arg0 : i32, i32
  }
  func.func @transform_3(%arg0: i32) -> (i32, i32) {
    %c0_i32 = arith.constant 0 : i32
    %c0_i32_0 = arith.constant 0 : i32
    return %c0_i32, %arg0 : i32, i32
  }
}

</mosaic_0001>

<bundles_post_ra>
// kernel: tpu_custom_call.1
= control target key start
LH: loop header
LB: loop body
LE: loop exit
PB: predicated region body
PF: predicated region fallthrough
CT: control target
= control target key end

     0   :  { %8 = vsyncpa [#allocation3], 0  ;;  %s245_s0 = inlined_call_operand.hbm [shape: f32[16,128], index: 0, kind: input, shape index: {}]   ;;  %s246_s1 = inlined_call_operand.vmem [shape: s32[1,128], index: 1, kind: input, shape index: {}]   ;;  %s247_s2 = inlined_call_operand.vmem [shape: f32[1,128], index: 2, kind: input, shape index: {}]   ;;  %s248_s3 = inlined_call_operand.hbm [shape: f32[1,128], index: 3, kind: output, shape index: {}]  }
   0x1   :  { %9 = vsyncpa [#allocation4], 0  ;;  %s190_s12 = smov [#allocation2]   ;;  %s142_s16 = scalar_lea.hbm %s245_s0, 256 }
   0x2   :  { %s15_s13 = sshll.u32 %s190_s12, 4  ;;  %p143_p0 = scmp.ne.s32.totalorder %s245_s0, %s142_s16  ;;  %s16_s13 = int_to_ptr.vmem [resolvable:$true] %s15_s13 }
   0x3   :  { %p146_p1 = scmp.lt.u32.totalorder %s142_s16, %s245_s0 }
   0x5   :  { %p148_p2 = pnand %p146_p1, %p143_p0 }
   0x7   :  { %151 = shalt.err (!%p148_p2)
}
   0x8   :  { %s152_s21 = scalar_lea.vmem %s16_s13, 256  ;;  %p157_p4 = scmp.lt.s32.totalorder %s16_s13, %s16_s13 }
   0x9   :  { %p153_p3 = scmp.ne.s32.totalorder %s16_s13, %s152_s21  ;;  %p158_p5 = scmp.lt.s32.totalorder %s152_s21, %s152_s21 }
   0xb   :  { %p159_p6 = por %p158_p5, %p157_p4 }
   0xd   :  { %p160_p7 = pnand %p159_p6, %p153_p3 }
   0xf   :  { %163 = shalt.err (!%p160_p7)
}
  0x10   :  { %s191_s22 = smov 128   ;;  %s192_s23 = smov 8  }
  0x11   :  { %21 = dma.hbm_to_vmem [thread:$0]  %s245_s0, 256, %s16_s13, [#allocation3], %s191_s22, %s191_s22, %s192_s23  }
  0x12   :  { %186 = dma.done.wait [#allocation3], 256  }
  0x13   :  { %187 = vsyncadd [#allocation3], 4294967040  ;;  %v29_v0 = vld [vmem:[#allocation2] sm:$0xff]  ;;  %v30_v1 = vld [vmem:[#allocation2 + $0x8] sm:$0xff]  ;;  %v55_v12 = vlaneseq  ;;  %v193_v24 = vmov 0.0  }
  0x14   :  { %v35_v2 = vand.u32 2147483647, %v29_v0  ;;  %v36_v3 = vand.u32 2147483647, %v30_v1  ;;  %v126_v14 = vld [vmem:[%s246_s1] ss:$0 sm:$0xff] }
  0x15   :  { %v56_v13 = vshrl.u32 %v55_v12, 7  ;;  %v33_v16 = vmax.f32 %v29_v0, 0.0  ;;  %v34_v18 = vmax.f32 %v30_v1, 0.0  ;;  %v32_v49 = vld [vmem:[%s247_s2] sm:$0x1]  ;;  %s194_s2 = smov [#allocation5]  }
  0x16   :  { %v37_v4 = vsub.f32 0.0, %v35_v2  ;;  %v38_v5 = vsub.f32 0.0, %v36_v3  ;;  %v101_v56 = vsub.f32 1.0, %v32_v49  ;;  %s117_s28 = sshll.u32 %s194_s2, 4  ;;  %s118_s28 = int_to_ptr.vmem [resolvable:$true] %s117_s28 }
  0x17   :  { %v57_v15 = vadd.s32 8, %v56_v13  ;;  %vm62_vm0 = vcmp.eq.s32.totalorder %v56_v13, %v126_v14  ;;  %vm68_vm2 = vcmp.lt.s32.totalorder %v56_v13, %v126_v14  ;;  %s164_s29 = scalar_lea.vmem %s118_s28, 16  ;;  %s168_s30 = scalar_lea.vmem %s118_s28, 32 }
  0x18   :  { %v39_v6 = vmul.f32 1.442695, %v37_v4  ;;  %v41_v7 = vmul.f32 1.442695, %v38_v5  ;;  %v127_v25 = vsel %vm62_vm0, 1.0, %v193_v24  ;;  %v102_v63 = vsub.f32 0.0, %v101_v56  ;;  %p165_p8 = scmp.ne.s32.totalorder %s118_s28, %s164_s29  ;;  %p169_p9 = scmp.lt.s32.totalorder %s118_s28, %s118_s28 }
  0x19   :  { %vm63_vm1 = vcmp.eq.s32.totalorder %v57_v15, %v126_v14  ;;  %vm69_vm3 = vcmp.lt.s32.totalorder %v57_v15, %v126_v14  ;;  %p170_p10 = scmp.lt.s32.totalorder %s168_s30, %s164_s29 }
  0x1a   :  { %134 = vpow2.f32 %v39_v6  ;;  %v128_v28 = vsel %vm63_vm1, 1.0, %v193_v24 }
  0x1b   :  { %136 = vpow2.f32 %v41_v7  ;;  %p171_p11 = por %p170_p10, %p169_p9 }
  0x1d   :  { %p172_p12 = pnand %p171_p11, %p165_p8 }
  0x24   :  { %v135_v8 = vpop.eup %134 }
  0x25   :  { %v137_v9 = vpop.eup %136  ;;  %v43_v10 = vadd.f32 1.0, %v135_v8 }
  0x26   :  { %v44_v11 = vadd.f32 1.0, %v137_v9 }
  0x27   :  { %138 = vlog2.f32 %v43_v10 }
  0x28   :  { %140 = vlog2.f32 %v44_v11 }
  0x31   :  { %v139_v17 = vpop.eup %138 }
  0x32   :  { %v141_v19 = vpop.eup %140  ;;  %v46_v20 = vmul.f32 0.6931472, %v139_v17 }
  0x33   :  { %v48_v21 = vmul.f32 0.6931472, %v141_v19 }
  0x34   :  { %v49_v22 = vadd.f32 %v46_v20, %v33_v16 }
  0x35   :  { %v50_v23 = vadd.f32 %v48_v21, %v34_v18 }
  0x36   :  { %v51_v26 = vsub.f32 0.0, %v49_v22  ;;  %v53_v27 = vsub.f32 %v29_v0, %v49_v22  ;;  %v105_v0 = vsub.f32 0.0, %v32_v49 }
  0x37   :  { %v52_v29 = vsub.f32 0.0, %v50_v23  ;;  %v54_v30 = vsub.f32 %v30_v1, %v50_v23 }
  0x38   :  { %v70_v31 = vsel %vm68_vm2, %v51_v26, 0.0  ;;  %v79_v32 = vmul.f32 %v127_v25, %v51_v26  ;;  %v88_v33 = vmul.f32 %v127_v25, %v53_v27 }
  0x39   :  { %v71_v34 = vsel %vm69_vm3, %v52_v29, 0.0  ;;  %v80_v35 = vmul.f32 %v128_v28, %v52_v29  ;;  %v89_v36 = vmul.f32 %v128_v28, %v54_v30 }
  0x3a   :  { %v72_v37 = vadd.f32 %v71_v34, %v70_v31 }
  0x3b   :  { %v81_v38 = vadd.f32 %v80_v35, %v79_v32  ;;  %v90_v39 = vadd.f32 %v89_v36, %v88_v33 }
  0x3c   :  { %v73_v40 = vrot.slane %v72_v37, 4 }
  0x3d   :  { %v82_v41 = vrot.slane %v81_v38, 4  ;;  %v91_v42 = vrot.slane %v90_v39, 4 }
  0x3e   :  { %v74_v43 = vadd.f32 %v73_v40, %v72_v37 }
  0x3f   :  { %v83_v44 = vadd.f32 %v82_v41, %v81_v38  ;;  %v92_v45 = vadd.f32 %v91_v42, %v90_v39 }
  0x40   :  { %v75_v46 = vrot.slane %v74_v43, 2 }
  0x41   :  { %v84_v47 = vrot.slane %v83_v44, 2  ;;  %v93_v48 = vrot.slane %v92_v45, 2 }
  0x42   :  { %v76_v50 = vadd.f32 %v75_v46, %v74_v43 }
  0x43   :  { %v85_v51 = vadd.f32 %v84_v47, %v83_v44  ;;  %v94_v52 = vadd.f32 %v93_v48, %v92_v45 }
  0x44   :  { %v77_v53 = vrot.slane %v76_v50, 1 }
  0x45   :  { %v86_v54 = vrot.slane %v85_v51, 1  ;;  %v95_v55 = vrot.slane %v94_v52, 1 }
  0x46   :  { %v78_v57 = vadd.f32 %v77_v53, %v76_v50 }
  0x47   :  { %v87_v58 = vadd.f32 %v86_v54, %v85_v51  ;;  %v96_v59 = vadd.f32 %v95_v55, %v94_v52 }
  0x48   :  { %v98_v60 = vmax.f32 %v78_v57, -16.118095 }
  0x49   :  { %v97_v61 = vadd.f32 %v87_v58, %v78_v57  ;;  %v100_v62 = vmax.f32 %v96_v59, -16.118095 }
  0x4b   :  { %v99_v1 = vmax.f32 %v97_v61, -16.118095  ;;  %v103_v2 = vadd.f32 %v100_v62, %v98_v60 }
  0x4d   :  { %v104_v3 = vmul.f32 %v103_v2, %v102_v63  ;;  %v106_v4 = vmul.f32 %v105_v0, %v99_v1 }
  0x4f   :  { %v107_v5 = vadd.f32 %v106_v4, %v104_v3  ;;  %v108_v6 = vmul.f32 0.0, %v104_v3 }
  0x51   :  { %v109_v7 = vadd.f32 %v108_v6, %v107_v5 }
  0x53   :  { %110 = vst [vmem:[#allocation5] sm:$0x1] %v109_v7 }
  0x54   :  { %175 = shalt.err (!%p172_p12)
}
  0x55   :  { %s176_s6 = scalar_lea.hbm %s248_s3, 16 }
  0x56   :  { %p177_p13 = scmp.ne.s32.totalorder %s248_s3, %s176_s6  ;;  %p180_p0 = scmp.lt.u32.totalorder %s176_s6, %s248_s3 }
  0x58   :  { %p182_p1 = pnand %p180_p0, %p177_p13 }
  0x5a   :  { %185 = shalt.err (!%p182_p1)
}
  0x5b   :  { %120 = dma.vmem_to_hbm [thread:$0]  %s118_s28, 16, %s248_s3, [#allocation4]  }
  0x5c   :  { %188 = dma.done.wait [#allocation4], 16  }
  0x5d   :  { %189 = vsyncadd [#allocation4], 4294967280 }
  0x5e   :  { %124 = vsyncpa [#allocation3], 1 }
  0x5f   :  { %125 = vsyncpa [#allocation4], 1 }

</bundles_post_ra>
